<compile_context>
chip_gen: v5e
topology: v5e:2x2
jax: 0.10.0
libtpu: 0.0.40
codegen_flags: <defaults>
</compile_context>

<pallas_src>
import functools

import jax
import jax.numpy as jnp
from jax import lax
from jax.experimental import pallas as pl
from jax.experimental.pallas import tpu as pltpu

_LANE = 128
_MIN_VMEM_LIMIT = 32 * 1024 * 1024


def _cdiv(a, b):
    return -(-a // b)


def _round_up(a, m):
    return _cdiv(a, m) * m


def _vmem_capacity_bytes():
    try:
        return int(pltpu.get_tpu_info().vmem_capacity_bytes)
    except Exception:
        return 64 * 1024 * 1024  # conservative default: v7x per-TensorCore VMEM


def _budgets(vmem_budget_bytes=None):
    """Return (tile byte budget, vmem_limit cap) with generation-aware headroom."""
    cap = _vmem_capacity_bytes()
    # v7x (64 MiB/TC): limit ~50 MiB, tile target ~36 MiB.
    # v5e/v6e (128 MiB): limit ~100 MiB, tile target ~72 MiB.
    vmem_limit_cap = max(min(cap - (14 << 20), 100 << 20), _MIN_VMEM_LIMIT)
    tile_budget = int(vmem_limit_cap * 0.72)
    if vmem_budget_bytes is not None:  # test hook: force the tiled path
        tile_budget = int(vmem_budget_bytes)
    return tile_budget, vmem_limit_cap


def _pick_block_rows(rows, pack, max_block_rows):
    """Pack-aligned row block that fits the budget and yields >= 2 near-equal
    blocks when rows allow it (balanced megacore sharding on v7x)."""
    if rows <= pack:
        return rows  # full-extent block (always legal); grid = 1
    rows_p = _round_up(rows, pack)
    total_packs = rows_p // pack
    budget_packs = max(1, max_block_rows // pack)
    n_blocks = max(2, _cdiv(total_packs, budget_packs))
    block_packs = max(1, _cdiv(total_packs, n_blocks))
    return block_packs * pack


# ----------------------------------------------------------------------------
# Kernels
# ----------------------------------------------------------------------------
def _fused_kernel(x_ref, o_ref, *, eps, n_spatial):
    # x_ref/o_ref: (block_rows, spatial) tile; each row is one (b, c) instance.
    x = x_ref[...].astype(jnp.float32)
    inv_n = 1.0 / float(n_spatial)
    s1 = jnp.sum(x, axis=-1, keepdims=True)
    s2 = jnp.sum(x * x, axis=-1, keepdims=True)
    mean = s1 * inv_n
    var = jnp.maximum(s2 * inv_n - mean * mean, 0.0)   # single pass, f32 accum
    rstd = lax.rsqrt(var + eps)                        # EUP
    # Fused store: x*rstd - mean*rstd avoids a second full-tile f32 temp.
    o_ref[...] = (x * rstd - mean * rstd).astype(o_ref.dtype)


def _stats_kernel(x_ref, mean_ref, rstd_ref, s1_ref, s2_ref, *,
                  eps, n_spatial, block_spatial, mask_last):
    # Grid (row_blocks, spatial_blocks); spatial axis is last & "arbitrary".
    j = pl.program_id(1)

    @pl.when(j == 0)
    def _():
        s1_ref[...] = jnp.zeros_like(s1_ref)
        s2_ref[...] = jnp.zeros_like(s2_ref)

    x = x_ref[...].astype(jnp.float32)
    if mask_last:
        # Last spatial block runs past the true extent; zero padded lanes so
        # sum(x)/sum(x^2) stay exact (divisor below is the true extent).
        col = j * block_spatial + lax.broadcasted_iota(jnp.int32, x.shape, 1)
        x = jnp.where(col < n_spatial, x, 0.0)

    s1_ref[...] += jnp.sum(x, axis=-1, keepdims=True)
    s2_ref[...] += jnp.sum(x * x, axis=-1, keepdims=True)

    @pl.when(j == pl.num_programs(1) - 1)
    def _():
        inv_n = 1.0 / float(n_spatial)
        mean = s1_ref[...] * inv_n
        var = jnp.maximum(s2_ref[...] * inv_n - mean * mean, 0.0)
        mean_ref[...] = mean
        rstd_ref[...] = lax.rsqrt(var + eps)


def _apply_kernel(x_ref, mean_ref, rstd_ref, o_ref):
    x = x_ref[...].astype(jnp.float32)
    mean = mean_ref[...]
    rstd = rstd_ref[...]
    o_ref[...] = (x * rstd - mean * rstd).astype(o_ref.dtype)


# ----------------------------------------------------------------------------
# Host-side wrappers
# ----------------------------------------------------------------------------
def _fused_path(x2d, eps, itemsize, pack, bytes_per_elem, tile_budget,
                vmem_limit_cap):
    rows, spatial = x2d.shape
    max_block_rows = max(
        pack, (tile_budget // (spatial * bytes_per_elem) // pack) * pack)
    block_rows = _pick_block_rows(rows, pack, max_block_rows)
    grid = (_cdiv(rows, block_rows),)
    footprint = block_rows * spatial * bytes_per_elem
    vmem_limit = int(min(max(int(footprint * 1.3), _MIN_VMEM_LIMIT),
                         vmem_limit_cap))

    kernel = functools.partial(_fused_kernel, eps=eps, n_spatial=spatial)
    return pl.pallas_call(
        kernel,
        out_shape=jax.ShapeDtypeStruct((rows, spatial), x2d.dtype),
        grid_spec=pltpu.PrefetchScalarGridSpec(
            num_scalar_prefetch=0,
            grid=grid,
            in_specs=[pl.BlockSpec((block_rows, spatial), lambda i: (i, 0))],
            out_specs=pl.BlockSpec((block_rows, spatial), lambda i: (i, 0)),
        ),
        compiler_params=pltpu.CompilerParams(
            dimension_semantics=("parallel",),
            vmem_limit_bytes=vmem_limit,
        ),
        cost_estimate=pl.CostEstimate(
            flops=6 * rows * spatial,
            transcendentals=rows,
            bytes_accessed=2 * rows * spatial * itemsize,
        ),
    )(x2d)


def _tiled_path(x2d, eps, itemsize, pack, bytes_per_elem, tile_budget,
                vmem_limit_cap, spatial_floor):
    rows, spatial = x2d.shape
    block_rows = rows if rows <= pack else pack
    max_block_spatial = max(
        _LANE, (tile_budget // (block_rows * bytes_per_elem) // _LANE) * _LANE)
    block_spatial = min(max_block_spatial, spatial_floor)  # 128-multiple, <= spatial
    grid = (_cdiv(rows, block_rows), _cdiv(spatial, block_spatial))

    footprint = block_rows * block_spatial * bytes_per_elem
    vmem_limit = int(min(max(int(footprint * 1.3), _MIN_VMEM_LIMIT),
                         vmem_limit_cap))
    mask_last = (spatial % block_spatial) != 0

    stats_kernel = functools.partial(
        _stats_kernel, eps=eps, n_spatial=spatial,
        block_spatial=block_spatial, mask_last=mask_last)

    mean, rstd = pl.pallas_call(
        stats_kernel,
        out_shape=(jax.ShapeDtypeStruct((rows, 1), jnp.float32),
                   jax.ShapeDtypeStruct((rows, 1), jnp.float32)),
        grid_spec=pltpu.PrefetchScalarGridSpec(
            num_scalar_prefetch=0,
            grid=grid,
            in_specs=[pl.BlockSpec((block_rows, block_spatial),
                                   lambda i, j: (i, j))],
            out_specs=[pl.BlockSpec((block_rows, 1), lambda i, j: (i, 0)),
                       pl.BlockSpec((block_rows, 1), lambda i, j: (i, 0))],
            scratch_shapes=[pltpu.VMEM((block_rows, 1), jnp.float32),
                            pltpu.VMEM((block_rows, 1), jnp.float32)],
        ),
        compiler_params=pltpu.CompilerParams(
            dimension_semantics=("parallel", "arbitrary"),
            vmem_limit_bytes=vmem_limit,
        ),
        cost_estimate=pl.CostEstimate(
            flops=3 * rows * spatial,
            transcendentals=rows,
            bytes_accessed=rows * spatial * itemsize,
        ),
    )(x2d)

    out2d = pl.pallas_call(
        _apply_kernel,
        out_shape=jax.ShapeDtypeStruct((rows, spatial), x2d.dtype),
        grid_spec=pltpu.PrefetchScalarGridSpec(
            num_scalar_prefetch=0,
            grid=grid,
            in_specs=[pl.BlockSpec((block_rows, block_spatial),
                                   lambda i, j: (i, j)),
                      pl.BlockSpec((block_rows, 1), lambda i, j: (i, 0)),
                      pl.BlockSpec((block_rows, 1), lambda i, j: (i, 0))],
            out_specs=pl.BlockSpec((block_rows, block_spatial),
                                   lambda i, j: (i, j)),
        ),
        compiler_params=pltpu.CompilerParams(
            dimension_semantics=("parallel", "parallel"),
            vmem_limit_bytes=vmem_limit,
        ),
        cost_estimate=pl.CostEstimate(
            flops=2 * rows * spatial,
            transcendentals=0,
            bytes_accessed=2 * rows * spatial * itemsize,
        ),
    )(x2d, mean, rstd)
    return out2d


def instance_norm(x, eps=1e-5, *, vmem_budget_bytes=None):
    """Dim-agnostic instance norm: normalizes over all non-(batch, channel) dims."""
    size = x.shape
    assert x.ndim >= 3, "instance_norm expects (B, C, spatial...)"
    rows = size[0] * size[1]
    spatial = 1
    for s in size[2:]:
        spatial *= s

    x2d = x.reshape(rows, spatial)
    itemsize = jnp.dtype(x.dtype).itemsize
    pack = max(8, 32 // max(1, itemsize))       # sublane packing per dtype
    bytes_per_elem = 4 * itemsize + 8           # 2x in + 2x out buffers + f32 temps

    tile_budget, vmem_limit_cap = _budgets(vmem_budget_bytes)

    spatial_p = _round_up(spatial, _LANE)
    spatial_floor = (spatial // _LANE) * _LANE  # largest dense lane extent <= spatial
    fused_min_tile = pack * spatial_p * bytes_per_elem

    if fused_min_tile <= tile_budget or spatial_floor == 0:
        out2d = _fused_path(x2d, eps, itemsize, pack, bytes_per_elem,
                            tile_budget, vmem_limit_cap)
    else:
        out2d = _tiled_path(x2d, eps, itemsize, pack, bytes_per_elem,
                            tile_budget, vmem_limit_cap, spatial_floor)

    out = out2d.reshape(size)
    assert out.shape == size
    return out


# ----------------------------------------------------------------------------
# Reference + self-test
# ----------------------------------------------------------------------------
def _reference_instance_norm(x, eps=1e-5):
    # Pure-JAX reference matching F.instance_norm (no affine, biased variance).
    axes = tuple(range(2, x.ndim))
    xf = x.astype(jnp.float32)
    mean = jnp.mean(xf, axis=axes, keepdims=True)
    var = jnp.mean((xf - mean) ** 2, axis=axes, keepdims=True)
    return ((xf - mean) * lax.rsqrt(var + eps)).astype(x.dtype)


def _check(name, x, **kw):
    out = jax.block_until_ready(instance_norm(x, **kw))
    ref = _reference_instance_norm(x)
    assert out.shape == x.shape
    assert jnp.allclose(out, ref, atol=1e-4, rtol=1e-4), f"mismatch vs reference: {name}"


if __name__ == "__main__":
    key = jax.random.PRNGKey(0)
    k1, k2, k3, k4 = jax.random.split(key, 4)

    # Primary shape: B=2, C=4, H=16, W=16 (rows=8, spatial=256) -> fused path.
    x1 = jax.random.normal(k1, (2, 4, 16, 16), dtype=jnp.float32) * 3.0 + 1.5
    _check("fused", x1)

    # Ragged rows (rows=12 -> grid of 2 row blocks, partial last block).
    x2 = jax.random.normal(k2, (2, 6, 16, 16), dtype=jnp.float32) * 0.7 - 2.0
    _check("ragged rows", x2)

    # Spatial not a multiple of 128 (full-extent lane block).
    x3 = jax.random.normal(k3, (2, 3, 10, 10), dtype=jnp.float32) * 2.0 + 0.5
    _check("non-128 spatial", x3)

    # Force the large-spatial tiled path (stats + normalize calls) with a tiny
    # artificial VMEM budget; exercises the masked partial last spatial block.
    x4 = jax.random.normal(k4, (2, 4, 40, 50), dtype=jnp.float32) * 1.3 - 0.7
    _check("spatial-tiled", x4, vmem_budget_bytes=192 * 1024)

    print("KERNEL_OK")
</pallas_src>

<mosaic_0001>
module attributes {stable_mosaic.version = 11 : i64} {
  func.func @_fused_kernel(%arg0: i32, %arg1: memref<8x256xf32, #tpu.memory_space<vmem>>, %arg2: memref<8x256xf32, #tpu.memory_space<vmem>>) attributes {dimension_semantics = [#tpu.dimension_semantics<parallel>], iteration_bounds = array<i64: 1>, scalar_prefetch = 0 : i64, scratch_operands = 0 : i64, tpu.core_type = #tpu.core_type<tc>, window_params = [{transform_indices = @transform_0, window_bounds = array<i64: 8, 256>}, {transform_indices = @transform_1, window_bounds = array<i64: 8, 256>}]} {
    %c0 = arith.constant 0 : index
    %c0_0 = arith.constant 0 : index
    %0 = vector.load %arg1[%c0, %c0_0] : memref<8x256xf32, #tpu.memory_space<vmem>>, vector<8x256xf32>
    %cst = arith.constant dense<0.000000e+00> : vector<8xf32>
    %1 = vector.multi_reduction <add>, %0, %cst [1] : vector<8x256xf32> to vector<8xf32>
    %2 = vector.shape_cast %1 : vector<8xf32> to vector<8x1xf32>
    %3 = arith.mulf %0, %0 : vector<8x256xf32>
    %cst_1 = arith.constant dense<0.000000e+00> : vector<8xf32>
    %4 = vector.multi_reduction <add>, %3, %cst_1 [1] : vector<8x256xf32> to vector<8xf32>
    %5 = vector.shape_cast %4 : vector<8xf32> to vector<8x1xf32>
    %cst_2 = arith.constant 3.906250e-03 : f32
    %6 = vector.broadcast %cst_2 : f32 to vector<8x1xf32>
    %7 = arith.mulf %2, %6 : vector<8x1xf32>
    %cst_3 = arith.constant 3.906250e-03 : f32
    %8 = vector.broadcast %cst_3 : f32 to vector<8x1xf32>
    %9 = arith.mulf %5, %8 : vector<8x1xf32>
    %10 = arith.mulf %7, %7 : vector<8x1xf32>
    %11 = arith.subf %9, %10 : vector<8x1xf32>
    %cst_4 = arith.constant 0.000000e+00 : f32
    %12 = vector.broadcast %cst_4 : f32 to vector<8x1xf32>
    %13 = arith.maximumf %11, %12 : vector<8x1xf32>
    %cst_5 = arith.constant 9.99999974E-6 : f32
    %14 = vector.broadcast %cst_5 : f32 to vector<8x1xf32>
    %15 = arith.addf %13, %14 : vector<8x1xf32>
    %16 = math.rsqrt %15 : vector<8x1xf32>
    %17 = vector.broadcast %16 : vector<8x1xf32> to vector<8x256xf32>
    %18 = arith.mulf %0, %17 : vector<8x256xf32>
    %19 = arith.mulf %7, %16 : vector<8x1xf32>
    %20 = vector.broadcast %19 : vector<8x1xf32> to vector<8x256xf32>
    %21 = arith.subf %18, %20 : vector<8x256xf32>
    %c0_6 = arith.constant 0 : index
    %c0_7 = arith.constant 0 : index
    %22 = vector.load %arg2[%c0_6, %c0_7] : memref<8x256xf32, #tpu.memory_space<vmem>>, vector<8x256xf32>
    tpu.vector_store %arg2[%c0_6, %c0_7], %21 {strides = array<i32>} : memref<8x256xf32, #tpu.memory_space<vmem>>, vector<8x256xf32>,
    return
  }
  func.func @transform_0(%arg0: i32) -> (i32, i32) {
    %c0_i32 = arith.constant 0 : i32
    %c0_i32_0 = arith.constant 0 : i32
    return %arg0, %c0_i32 : i32, i32
  }
  func.func @transform_1(%arg0: i32) -> (i32, i32) {
    %c0_i32 = arith.constant 0 : i32
    %c0_i32_0 = arith.constant 0 : i32
    return %arg0, %c0_i32 : i32, i32
  }
}

</mosaic_0001>

<bundles_post_ra>
// kernel: tpu_custom_call.1
= control target key start
LH: loop header
LB: loop body
LE: loop exit
PB: predicated region body
PF: predicated region fallthrough
CT: control target
= control target key end

     0   :  { %6 = vsyncpa [#allocation3], 0  ;;  %s147_s0 = inlined_call_operand.hbm [shape: f32[8,256], index: 0, kind: input, shape index: {}]   ;;  %s148_s1 = inlined_call_operand.hbm [shape: f32[8,256], index: 1, kind: output, shape index: {}]  }
   0x1   :  { %7 = vsyncpa [#allocation4], 0  ;;  %s13_s8 = sshll.u32 %s147_s0, 4  ;;  %s129_s9 = smov [#allocation2]   ;;  %s14_s8 = int_to_ptr.hbm [resolvable:$true] %s13_s8 }
   0x2   :  { %s15_s10 = sshll.u32 %s129_s9, 4  ;;  %s16_s10 = int_to_ptr.vmem [resolvable:$true] %s15_s10 }
   0x3   :  { %18 = dma.hbm_to_vmem [thread:$0]  %s14_s8, 256, %s16_s10, [#allocation3]  }
   0x4   :  { %125 = dma.done.wait [#allocation3], 256  }
   0x5   :  { %126 = vsyncadd [#allocation3], 4294967040  ;;  %v23_v0 = vld [vmem:[#allocation2] sm:$0xff]  ;;  %v24_v1 = vld [vmem:[#allocation2 + $0x8] sm:$0xff]  ;;  %s130_s0 = smov [#allocation5]   ;;  %s63_s14 = sshll.u32 %s148_s1, 4  ;;  %s64_s14 = int_to_ptr.hbm [resolvable:$true] %s63_s14 }
   0x6   :  { %v25_v2 = vadd.f32 %v24_v1, %v23_v0  ;;  %v28_v3 = vmul.f32 %v23_v0, %v23_v0  ;;  %v29_v4 = vmul.f32 %v24_v1, %v24_v1  ;;  %s61_s11 = sshll.u32 %s130_s0, 4  ;;  %s62_s11 = int_to_ptr.vmem [resolvable:$true] %s61_s11 }
   0x8   :  { %26 = vadd.xlane.f32.xlu0 %v25_v2  ;;  %v30_v5 = vadd.f32 %v29_v4, %v28_v3 }
  0x10   :  { %31 = vadd.xlane.f32.xlu0 %v30_v5 }
  0x7b   :  { %v27_v6 = vpop.xlane.xlu0 %26 }
  0x7c   :  { %v33_v7 = vmul.f32 0.00390625, %v27_v6 }
  0x7e   :  { %v35_v9 = vmul.f32 %v33_v7, %v33_v7 }
  0x83   :  { %v32_v8 = vpop.xlane.xlu0 %31 }
  0x84   :  { %v34_v10 = vmul.f32 0.00390625, %v32_v8 }
  0x86   :  { %v36_v11 = vsub.f32 %v34_v10, %v35_v9 }
  0x88   :  { %v37_v12 = vmax.f32 %v36_v11, 0.0 }
  0x8a   :  { %v38_v13 = vadd.f32 1e-05, %v37_v12 }
  0x8c   :  { %75 = vrsqrt.f32 %v38_v13  ;;  %vm45_vm1 = vweird.f32 %v38_v13 }
  0x92   :  { %v76_v14 = vpop.eup %75 }
  0x93   :  { %v40_v15 = vmul.f32 %v76_v14, %v38_v13  ;;  %vm46_vm0 = vweird.f32 %v76_v14 }
  0x94   :  { %vm47_vm2 = vmor %vm45_vm1, %vm46_vm0 }
  0x95   :  { %v41_v16 = vmul.f32 %v76_v14, %v40_v15 }
  0x97   :  { %v42_v17 = vmul.f32 0.5, %v41_v16 }
  0x99   :  { %v43_v18 = vsub.f32 1.5, %v42_v17 }
  0x9b   :  { %v44_v19 = vmul.f32 %v76_v14, %v43_v18 }
  0x9d   :  { %v48_v20 = vsel %vm47_vm2, %v76_v14, %v44_v19 }
  0x9e   :  { %v49_v21 = vmul.f32 %v48_v20, %v23_v0  ;;  %v50_v22 = vmul.f32 %v48_v20, %v24_v1  ;;  %v51_v23 = vmul.f32 %v48_v20, %v33_v7 }
  0xa0   :  { %v52_v24 = vsub.f32 %v49_v21, %v51_v23  ;;  %v53_v25 = vsub.f32 %v50_v22, %v51_v23 }
  0xa2   :  { %54 = vst [vmem:[#allocation5] sm:$0xff] %v52_v24 }
  0xa3   :  { %55 = vst [vmem:[#allocation5 + $0x8] sm:$0xff] %v53_v25 }
  0xa4   :  { %66 = dma.vmem_to_hbm [thread:$0]  %s62_s11, 256, %s64_s14, [#allocation4]  }
  0xa5   :  { %127 = dma.done.wait [#allocation4], 256  }
  0xa6   :  { %128 = vsyncadd [#allocation4], 4294967040 }
  0xa7   :  { %71 = vsyncpa [#allocation3], 1 }
  0xa8   :  { %72 = vsyncpa [#allocation4], 1 }

</bundles_post_ra>
